<compile_context>
chip_gen: v6e
topology: v6e:2x2x1
jax: 0.10.0
libtpu: 0.0.40
codegen_flags: <defaults>
</compile_context>

<pallas_src>
import jax
import jax.numpy as jnp
from jax.experimental import pallas as pl
from jax.experimental.pallas import tpu as pltpu
from jax.scipy.linalg import block_diag


def _round_up(x, m):
    return ((x + m - 1) // m) * m


def _mxu_lane_target():
    """Packed lane-width target: 256 on v6e/v7x (2x256^2 MXU), else 128."""
    try:
        kind = jax.devices()[0].device_kind.lower()
    except Exception:
        return 128
    if ("v6" in kind) or ("v7" in kind) or ("7x" in kind):
        return 256
    return 128


def _softplus_stable(z):
    """Numerically stable softplus using only exp/log/abs/max (all lower on VPU/EUP)."""
    return jnp.maximum(z, 0.0) + jnp.log(1.0 + jnp.exp(-jnp.abs(z)))


def _make_mlp_kernel(num_linear, relu_in_bf16):
    """Fused MLP kernel: refs = (x, W0, b0, W1, b1, ..., out)."""

    def kernel(*refs):
        x_ref = refs[0]
        o_ref = refs[-1]
        p_refs = refs[1:-1]

        # In-kernel bf16 cast (free on the VPU; avoids an extra HBM pass a
        # wrapper-side astype would add).  No-op if x is already bf16.
        h = x_ref[...].astype(jnp.bfloat16)
        for li in range(num_linear):
            w = p_refs[2 * li][...]        # bf16 (P*in_l, P*out_l) block-diagonal
            b = p_refs[2 * li + 1][...]    # f32  (1, P*out_l)
            # MXU matmul with f32 accumulation; bias in f32.
            z = jnp.dot(h, w, preferred_element_type=jnp.float32) + b
            if li < num_linear - 1:
                # ReLU; Dropout(0.1) is identity at inference time.
                if relu_in_bf16:
                    # bf16 VALU exists on v6e/v7x: halves VALU work / vreg pressure.
                    h = jnp.maximum(z.astype(jnp.bfloat16), 0)
                else:
                    h = jnp.maximum(z, 0.0).astype(jnp.bfloat16)
            else:
                h = _softplus_stable(z)    # f32
        o_ref[...] = h.astype(o_ref.dtype)

    return kernel


def evidence_collector_forward(x, weights, biases, *, tile_b=4096):
    """Fused EvidenceCollector forward pass.

    x:       (B, dims[0]) float32 (or bfloat16 from an upstream producer)
    weights: list of (in_l, out_l) float32 arrays (transposed vs torch)
    biases:  list of (out_l,)       float32 arrays
    Returns (B, num_classes) float32.
    """
    num_linear = len(weights)
    B, d_in = x.shape
    out_dim = weights[-1].shape[1]

    # --- Pack factor: fold P batch rows per lane-dense row ------------------
    lane_target = _mxu_lane_target()
    pack = max(1, min(lane_target // d_in, 16))

    # Pad B only up to a multiple of P (at most P-1 rows), never to tile_b.
    b_pad = _round_up(B, pack)
    if b_pad != B:
        x = jnp.pad(x, ((0, b_pad - B), (0, 0)))
    rows = b_pad // pack

    # Row-major reshape is free (no data movement): (B, d_in) -> (B/P, P*d_in).
    xp = x.reshape(rows, pack * d_in)

    # Block-diagonal weight / tiled bias packing (tiny: <~0.5 MiB bf16 total).
    w_ops, b_ops = [], []
    for w, b in zip(weights, biases):
        wp = block_diag(*([w] * pack)) if pack > 1 else w
        w_ops.append(wp.astype(jnp.bfloat16))
        b_ops.append(jnp.tile(b, pack).reshape(1, -1).astype(jnp.float32))

    # --- Row tiling of packed rows ------------------------------------------
    tile_rows = max(8, (max(tile_b, 8) // pack) // 8 * 8)
    if rows >= 16:
        # Keep >=2 grid steps so both v7x TensorCores get work.
        tile_rows = min(tile_rows, _round_up((rows + 1) // 2, 8))
    tile_rows = min(tile_rows, rows)
    grid = (pl.cdiv(rows, tile_rows),)   # partial last block is fine (masked)

    operands = [xp]
    in_specs = [pl.BlockSpec((tile_rows, pack * d_in), lambda i: (i, 0))]
    for w, b in zip(w_ops, b_ops):
        operands.append(w)
        operands.append(b)
        # Constant block index -> weights/biases stay VMEM-resident across
        # grid steps (no re-DMA).
        in_specs.append(pl.BlockSpec(w.shape, lambda i: (0, 0)))
        in_specs.append(pl.BlockSpec(b.shape, lambda i: (0, 0)))

    out_spec = pl.BlockSpec((tile_rows, pack * out_dim), lambda i: (i, 0))

    out = pl.pallas_call(
        _make_mlp_kernel(num_linear, relu_in_bf16=(lane_target >= 256)),
        out_shape=jax.ShapeDtypeStruct((rows, pack * out_dim), jnp.float32),
        grid=grid,
        in_specs=in_specs,
        out_specs=out_spec,
        compiler_params=pltpu.CompilerParams(
            # Packed-row tiles are independent -> shard across TCs on v7x.
            dimension_semantics=("parallel",),
            # VMEM footprint at defaults is ~2-3 MiB (x tile + packed weights
            # + intermediates), far under every generation's limit.
        ),
    )(*operands)

    # Unpack rows (free reshape) and drop padding.
    return out.reshape(b_pad, out_dim)[:B]


# ----------------------------------------------------------------------------
# Reference implementations and test harness
# ----------------------------------------------------------------------------

def _init_params(key, dims, num_classes):
    """Deterministic Linear-layer init (uniform, torch-like fan_in scaling)."""
    layer_dims = list(dims) + [num_classes]
    weights, biases = [], []
    for i in range(len(layer_dims) - 1):
        fan_in, fan_out = layer_dims[i], layer_dims[i + 1]
        key, kw, kb = jax.random.split(key, 3)
        bound = 1.0 / jnp.sqrt(fan_in)
        # Stored as (in, out): transpose of torch's (out, in) weight.
        w = jax.random.uniform(kw, (fan_in, fan_out), jnp.float32, -bound, bound)
        b = jax.random.uniform(kb, (fan_out,), jnp.float32, -bound, bound)
        weights.append(w)
        biases.append(b)
    return weights, biases


def _reference_forward(x, weights, biases):
    """Pure-JAX reference mirroring the kernel's dtype policy (no packing)."""
    h = x.astype(jnp.bfloat16)
    n = len(weights)
    for i, (w, b) in enumerate(zip(weights, biases)):
        z = jnp.dot(h, w.astype(jnp.bfloat16),
                    preferred_element_type=jnp.float32) + b
        if i < n - 1:
            h = jnp.maximum(z, 0.0).astype(jnp.bfloat16)
        else:
            h = _softplus_stable(z)
    return h


def _reference_forward_f32(x, weights, biases):
    """Full-f32 reference (loose sanity check on bf16 drift)."""
    h = x
    n = len(weights)
    for i, (w, b) in enumerate(zip(weights, biases)):
        h = h @ w + b
        h = jnp.maximum(h, 0.0) if i < n - 1 else jnp.logaddexp(h, 0.0)
    return h


if __name__ == "__main__":
    # Small shapes consistent with the module: dims=[32, 64, 32], 4 classes.
    dims = [32, 64, 32]
    num_classes = 4

    key = jax.random.PRNGKey(0)
    weights, biases = _init_params(key, dims, num_classes)

    # Case 1: batch divisible by the pack factor.
    key, kx1 = jax.random.split(key)
    x1 = jax.random.normal(kx1, (8, dims[0]), jnp.float32)
    out1 = jax.block_until_ready(evidence_collector_forward(x1, weights, biases))

    # Case 2: ragged batch (exercises pack-padding + partial-block handling).
    key, kx2 = jax.random.split(key)
    x2 = jax.random.normal(kx2, (50, dims[0]), jnp.float32)
    out2 = jax.block_until_ready(evidence_collector_forward(x2, weights, biases))

    for x, out in ((x1, out1), (x2, out2)):
        ref = _reference_forward(x, weights, biases)
        ref_f32 = _reference_forward_f32(x, weights, biases)
        assert out.shape == (x.shape[0], num_classes)
        assert bool(jnp.all(out >= 0.0))                            # softplus > 0
        assert jnp.allclose(out, ref, atol=1e-3, rtol=1e-3)         # same dtype policy
        assert jnp.allclose(out, ref_f32, atol=5e-2, rtol=5e-2)     # bf16 vs f32 drift

    print("KERNEL_OK")
</pallas_src>

<mosaic_0001>
module attributes {stable_mosaic.version = 11 : i64} {
  func.func @kernel(%arg0: i32, %arg1: memref<2x128xf32, #tpu.memory_space<vmem>>, %arg2: memref<128x256xbf16, #tpu.memory_space<vmem>>, %arg3: memref<1x256xf32, #tpu.memory_space<vmem>>, %arg4: memref<256x128xbf16, #tpu.memory_space<vmem>>, %arg5: memref<1x128xf32, #tpu.memory_space<vmem>>, %arg6: memref<128x16xbf16, #tpu.memory_space<vmem>>, %arg7: memref<1x16xf32, #tpu.memory_space<vmem>>, %arg8: memref<2x16xf32, #tpu.memory_space<vmem>>) attributes {dimension_semantics = [#tpu.dimension_semantics<parallel>], iteration_bounds = array<i64: 1>, scalar_prefetch = 0 : i64, scratch_operands = 0 : i64, tpu.core_type = #tpu.core_type<tc>, window_params = [{transform_indices = @transform_0, window_bounds = array<i64: 2, 128>}, {pipeline_mode = #tpu.pipeline_mode<synchronous>, transform_indices = @transform_1, window_bounds = array<i64: 128, 256>}, {pipeline_mode = #tpu.pipeline_mode<synchronous>, transform_indices = @transform_2, window_bounds = array<i64: 1, 256>}, {pipeline_mode = #tpu.pipeline_mode<synchronous>, transform_indices = @transform_3, window_bounds = array<i64: 256, 128>}, {pipeline_mode = #tpu.pipeline_mode<synchronous>, transform_indices = @transform_4, window_bounds = array<i64: 1, 128>}, {pipeline_mode = #tpu.pipeline_mode<synchronous>, transform_indices = @transform_5, window_bounds = array<i64: 128, 16>}, {pipeline_mode = #tpu.pipeline_mode<synchronous>, transform_indices = @transform_6, window_bounds = array<i64: 1, 16>}, {transform_indices = @transform_7, window_bounds = array<i64: 2, 16>}]} {
    %c0 = arith.constant 0 : index
    %c0_0 = arith.constant 0 : index
    %0 = vector.load %arg1[%c0, %c0_0] : memref<2x128xf32, #tpu.memory_space<vmem>>, vector<2x128xf32>
    %1 = arith.truncf %0 : vector<2x128xf32> to vector<2x128xbf16>
    %c0_1 = arith.constant 0 : index
    %c0_2 = arith.constant 0 : index
    %2 = vector.load %arg2[%c0_1, %c0_2] : memref<128x256xbf16, #tpu.memory_space<vmem>>, vector<128x256xbf16>
    %c0_3 = arith.constant 0 : index
    %c0_4 = arith.constant 0 : index
    %3 = vector.load %arg3[%c0_3, %c0_4] : memref<1x256xf32, #tpu.memory_space<vmem>>, vector<1x256xf32>
    %cst = arith.constant dense<0.000000e+00> : vector<2x256xf32>
    %4 = tpu.matmul %1, %2, %cst {dimension_numbers = #tpu.dot_dimension_numbers<[1], [0], [0], [1], [0, 0, 1, 1], [], []>} : vector<2x128xbf16>, vector<128x256xbf16>, vector<2x256xf32> -> vector<2x256xf32>
    %5 = vector.broadcast %3 : vector<1x256xf32> to vector<2x256xf32>
    %6 = arith.addf %4, %5 : vector<2x256xf32>
    %cst_5 = arith.constant 0.000000e+00 : f32
    %7 = vector.broadcast %cst_5 : f32 to vector<2x256xf32>
    %8 = arith.maximumf %6, %7 : vector<2x256xf32>
    %9 = arith.truncf %8 : vector<2x256xf32> to vector<2x256xbf16>
    %c0_6 = arith.constant 0 : index
    %c0_7 = arith.constant 0 : index
    %10 = vector.load %arg4[%c0_6, %c0_7] : memref<256x128xbf16, #tpu.memory_space<vmem>>, vector<256x128xbf16>
    %c0_8 = arith.constant 0 : index
    %c0_9 = arith.constant 0 : index
    %11 = vector.load %arg5[%c0_8, %c0_9] : memref<1x128xf32, #tpu.memory_space<vmem>>, vector<1x128xf32>
    %cst_10 = arith.constant dense<0.000000e+00> : vector<2x128xf32>
    %12 = tpu.matmul %9, %10, %cst_10 {dimension_numbers = #tpu.dot_dimension_numbers<[1], [0], [0], [1], [0, 0, 1, 1], [], []>} : vector<2x256xbf16>, vector<256x128xbf16>, vector<2x128xf32> -> vector<2x128xf32>
    %13 = vector.broadcast %11 : vector<1x128xf32> to vector<2x128xf32>
    %14 = arith.addf %12, %13 : vector<2x128xf32>
    %cst_11 = arith.constant 0.000000e+00 : f32
    %15 = vector.broadcast %cst_11 : f32 to vector<2x128xf32>
    %16 = arith.maximumf %14, %15 : vector<2x128xf32>
    %17 = arith.truncf %16 : vector<2x128xf32> to vector<2x128xbf16>
    %c0_12 = arith.constant 0 : index
    %c0_13 = arith.constant 0 : index
    %18 = vector.load %arg6[%c0_12, %c0_13] : memref<128x16xbf16, #tpu.memory_space<vmem>>, vector<128x16xbf16>
    %c0_14 = arith.constant 0 : index
    %c0_15 = arith.constant 0 : index
    %19 = vector.load %arg7[%c0_14, %c0_15] : memref<1x16xf32, #tpu.memory_space<vmem>>, vector<1x16xf32>
    %cst_16 = arith.constant dense<0.000000e+00> : vector<2x16xf32>
    %20 = tpu.matmul %17, %18, %cst_16 {dimension_numbers = #tpu.dot_dimension_numbers<[1], [0], [0], [1], [0, 0, 1, 1], [], []>} : vector<2x128xbf16>, vector<128x16xbf16>, vector<2x16xf32> -> vector<2x16xf32>
    %21 = vector.broadcast %19 : vector<1x16xf32> to vector<2x16xf32>
    %22 = arith.addf %20, %21 : vector<2x16xf32>
    %cst_17 = arith.constant 0.000000e+00 : f32
    %23 = vector.broadcast %cst_17 : f32 to vector<2x16xf32>
    %24 = arith.maximumf %22, %23 : vector<2x16xf32>
    %25 = math.absf %22 : vector<2x16xf32>
    %cst_18 = arith.constant 0.000000e+00 : f32
    %26 = vector.broadcast %cst_18 : f32 to vector<2x16xf32>
    %27 = arith.subf %26, %25 : vector<2x16xf32>
    %28 = math.exp %27 : vector<2x16xf32>
    %cst_19 = arith.constant 1.000000e+00 : f32
    %29 = vector.broadcast %cst_19 : f32 to vector<2x16xf32>
    %30 = arith.addf %29, %28 : vector<2x16xf32>
    %31 = math.log %30 : vector<2x16xf32>
    %32 = arith.addf %24, %31 : vector<2x16xf32>
    %c0_20 = arith.constant 0 : index
    %c0_21 = arith.constant 0 : index
    %33 = vector.load %arg8[%c0_20, %c0_21] : memref<2x16xf32, #tpu.memory_space<vmem>>, vector<2x16xf32>
    tpu.vector_store %arg8[%c0_20, %c0_21], %32 {strides = array<i32>} : memref<2x16xf32, #tpu.memory_space<vmem>>, vector<2x16xf32>,
    return
  }
  func.func @transform_0(%arg0: i32) -> (i32, i32) {
    %c0_i32 = arith.constant 0 : i32
    %c0_i32_0 = arith.constant 0 : i32
    return %arg0, %c0_i32 : i32, i32
  }
  func.func @transform_1(%arg0: i32) -> (i32, i32) {
    %c0_i32 = arith.constant 0 : i32
    %c0_i32_0 = arith.constant 0 : i32
    %c0_i32_1 = arith.constant 0 : i32
    return %c0_i32, %c0_i32_0 : i32, i32
  }
  func.func @transform_2(%arg0: i32) -> (i32, i32) {
    %c0_i32 = arith.constant 0 : i32
    %c0_i32_0 = arith.constant 0 : i32
    %c0_i32_1 = arith.constant 0 : i32
    return %c0_i32, %c0_i32_0 : i32, i32
  }
  func.func @transform_3(%arg0: i32) -> (i32, i32) {
    %c0_i32 = arith.constant 0 : i32
    %c0_i32_0 = arith.constant 0 : i32
    %c0_i32_1 = arith.constant 0 : i32
    return %c0_i32, %c0_i32_0 : i32, i32
  }
  func.func @transform_4(%arg0: i32) -> (i32, i32) {
    %c0_i32 = arith.constant 0 : i32
    %c0_i32_0 = arith.constant 0 : i32
    %c0_i32_1 = arith.constant 0 : i32
    return %c0_i32, %c0_i32_0 : i32, i32
  }
  func.func @transform_5(%arg0: i32) -> (i32, i32) {
    %c0_i32 = arith.constant 0 : i32
    %c0_i32_0 = arith.constant 0 : i32
    %c0_i32_1 = arith.constant 0 : i32
    return %c0_i32, %c0_i32_0 : i32, i32
  }
  func.func @transform_6(%arg0: i32) -> (i32, i32) {
    %c0_i32 = arith.constant 0 : i32
    %c0_i32_0 = arith.constant 0 : i32
    %c0_i32_1 = arith.constant 0 : i32
    return %c0_i32, %c0_i32_0 : i32, i32
  }
  func.func @transform_7(%arg0: i32) -> (i32, i32) {
    %c0_i32 = arith.constant 0 : i32
    %c0_i32_0 = arith.constant 0 : i32
    return %arg0, %c0_i32 : i32, i32
  }
}

</mosaic_0001>

<bundles_post_ra>
// kernel: tpu_custom_call.1
= control target key start
LH: loop header
LB: loop body
LE: loop exit
PB: predicated region body
PF: predicated region fallthrough
CT: control target
= control target key end

     0   :  { %12 = vsyncpa [#allocation3], 0  ;;  %s842_s0 = inlined_call_operand.vmem [shape: f32[2,128], index: 0, kind: input, shape index: {}]   ;;  %s843_s1 = inlined_call_operand.hbm [shape: bf16[128,256], index: 1, kind: input, shape index: {}]   ;;  %s844_s2 = inlined_call_operand.vmem [shape: f32[1,256], index: 2, kind: input, shape index: {}]   ;;  %s845_s3 = inlined_call_operand.hbm [shape: bf16[256,128], index: 3, kind: input, shape index: {}]   ;;  %s846_s4 = inlined_call_operand.vmem [shape: f32[1,128], index: 4, kind: input, shape index: {}]   ;;  %s847_s5 = inlined_call_operand.vmem [shape: bf16[128,16], index: 5, kind: input, shape index: {}]   ;;  %s848_s6 = inlined_call_operand.vmem [shape: f32[1,16], index: 6, kind: input, shape index: {}]   ;;  %s849_s7 = inlined_call_operand.hbm [shape: f32[2,16], index: 7, kind: output, shape index: {}]  }
   0x1   :  { %13 = vsyncpa [#allocation6], 0 }
   0x2   :  { %14 = vsyncpa [#allocation4], 0  ;;  %s747_s24 = smov [#allocation2]  }
   0x3   :  { %s22_s25 = sshll.u32 %s747_s24, 4  ;;  %s23_s25 = int_to_ptr.vmem [resolvable:$true] %s22_s25 }
   0x4   :  { %s689_s26 = scalar_lea.vmem %s23_s25, 2048  ;;  %p694_p1 = scmp.lt.s32.totalorder %s23_s25, %s23_s25 }
   0x5   :  { %p690_p0 = scmp.ne.s32.totalorder %s23_s25, %s689_s26  ;;  %p695_p2 = scmp.lt.s32.totalorder %s689_s26, %s689_s26 }
   0x7   :  { %p696_p3 = por %p695_p2, %p694_p1 }
   0x9   :  { %p697_p4 = pnand %p696_p3, %p690_p0 }
   0xb   :  { %700 = shalt.err (!%p697_p4)
}
   0xc   :  { %s748_s27 = smov 128   ;;  %s749_s28 = smov 8  }
   0xd   :  { %28 = dma.hbm_to_vmem [thread:$0]  %s843_s1, 2048, %s23_s25, [#allocation3], %s748_s27, %s748_s27, %s749_s28  }
   0xe   :  { %s750_s8 = smov [#allocation5]  }
   0xf   :  { %s36_s9 = sshll.u32 %s750_s8, 4  ;;  %s37_s9 = int_to_ptr.vmem [resolvable:$true] %s36_s9 }
  0x10   :  { %s709_s10 = scalar_lea.vmem %s37_s9, 2048  ;;  %p714_p6 = scmp.lt.s32.totalorder %s37_s9, %s37_s9 }
  0x11   :  { %p710_p5 = scmp.ne.s32.totalorder %s37_s9, %s709_s10  ;;  %p715_p7 = scmp.lt.s32.totalorder %s709_s10, %s709_s10 }
  0x13   :  { %p716_p8 = por %p715_p7, %p714_p6 }
  0x15   :  { %p717_p9 = pnand %p716_p8, %p710_p5 }
  0x17   :  { %720 = shalt.err (!%p717_p9)
}
  0x18   :  { %s751_s11 = smov 64   ;;  %s752_s12 = smov 4  }
  0x19   :  { %42 = dma.hbm_to_vmem [thread:$0]  %s845_s3, 2048, %s37_s9, [#allocation6], %s751_s11, %s751_s11, %s752_s12  }
  0x1a   :  { %741 = dma.done.wait [#allocation3], 2048  }
  0x1b   :  { %742 = vsyncadd [#allocation3], 4294965248 }
  0x1c   :  { %743 = dma.done.wait [#allocation6], 2048  }
  0x1d   :  { %744 = vsyncadd [#allocation6], 4294965248  ;;  %v753_v0 = vmov 0   ;;  %v629_v1 = vld [vmem:[#allocation2 + $0x74] ss:$8 sps:$4 sm:$0xff]   ;;  %v657_v15 = vld [vmem:[#allocation5 + $0x68] sm:$0xff]   ;;  %v76_v41 = vlaneseq }
  0x1e   :  { %198 = vmatprep.mubr.bf16.mxu0 %v753_v0  ;;  %v631_v2 = vld [vmem:[#allocation2 + $0x70] ss:$8 sps:$4 sm:$0xff]   ;;  %166 = vmatprep.subr.bf16.mxu0 %v629_v1  ;;  %v632_v3 = vld [vmem:[#allocation2 + $0x64] ss:$8 sps:$4 sm:$0xff]   ;;  %v634_v4 = vld [vmem:[#allocation2 + $0x60] ss:$8 sps:$4 sm:$0xff]  }
  0x1f   :  { %167 = vmatpush1.bf16.msra.mxu0 %v631_v2  ;;  %v635_v5 = vld [vmem:[#allocation2 + $0x54] ss:$8 sps:$4 sm:$0xff]   ;;  %v637_v6 = vld [vmem:[#allocation2 + $0x50] ss:$8 sps:$4 sm:$0xff]   ;;  %v638_v7 = vld [vmem:[#allocation2 + $0x44] ss:$8 sps:$4 sm:$0xff]  }
  0x20   :  { %168 = vmatprep.subr.bf16.mxu0 %v632_v3  ;;  %v640_v8 = vld [vmem:[#allocation2 + $0x40] ss:$8 sps:$4 sm:$0xff]   ;;  %v641_v9 = vld [vmem:[#allocation2 + $0x34] ss:$8 sps:$4 sm:$0xff]   ;;  %v643_v12 = vld [vmem:[#allocation2 + $0x30] ss:$8 sps:$4 sm:$0xff]  }
  0x21   :  { %v653_v10 = vld [vmem:[#allocation5 + $0x78] sm:$0xff]   ;;  %v655_v13 = vld [vmem:[#allocation5 + $0x70] sm:$0xff]   ;;  %v644_v16 = vld [vmem:[#allocation2 + $0x24] ss:$8 sps:$4 sm:$0xff]   ;;  %v754_v36 = vmov 0.0   ;;  %v77_v42 = vshrl.u32 %v76_v41, 7 }
  0x22   :  { %v654_v11 = vld [vmem:[#allocation5 + $0x38] sm:$0xff]   ;;  %568 = vmatprep.subr.bf16.mxu1 %v653_v10  ;;  %v656_v14 = vld [vmem:[#allocation5 + $0x30] sm:$0xff]   ;;  %v646_v17 = vld [vmem:[#allocation2 + $0x20] ss:$8 sps:$4 sm:$0xff]   ;;  %vm755_vm0 = vmmov 0   ;;  %vm508_vm1 = vcmask 123904  }
  0x23   :  { %169 = vmatpush1.bf16.msra.mxu0 %v634_v4  ;;  %569 = vmatpush3.bf16.msra.mxu1 %v654_v11  ;;  %v658_v18 = vld [vmem:[#allocation5 + $0x28] sm:$0xff]   ;;  %v659_v19 = vld [vmem:[#allocation5 + $0x60] sm:$0xff]   ;;  %v647_v20 = vld [vmem:[#allocation2 + $0x14] ss:$8 sps:$4 sm:$0xff]   ;;  %v78_v43 = vsub.s32 0, %v77_v42  ;;  %v82_v45 = vsub.s32 1, %v77_v42 }
  0x24   :  { %170 = vmatprep.subr.bf16.mxu0 %v635_v5  ;;  %570 = vmatprep.subr.bf16.mxu1 %v655_v13  ;;  %v649_v21 = vld [vmem:[#allocation2 + $0x10] ss:$8 sps:$4 sm:$0xff]   ;;  %v650_v22 = vld [vmem:[#allocation2 + $0x4] ss:$8 sps:$4 sm:$0xff]   ;;  %v652_v26 = vld [vmem:[#allocation2] ss:$8 sps:$4 sm:$0xff]  }
  0x25   :  { %v660_v23 = vld [vmem:[#allocation5 + $0x20] sm:$0xff]   ;;  %v661_v24 = vld [vmem:[#allocation5 + $0x58] sm:$0xff]   ;;  %v663_v28 = vld [vmem:[#allocation5 + $0x50] sm:$0xff]  }
  0x26   :  { %v662_v25 = vld [vmem:[#allocation5 + $0x18] sm:$0xff]   ;;  %v56_v27 = vld [vmem:[%s842_s0] sm:$0x3]  ;;  %v664_v29 = vld [vmem:[#allocation5 + $0x10] sm:$0xff]  }
  0x27   :  { %171 = vmatpush1.bf16.msra.mxu0 %v637_v6  ;;  %571 = vmatpush3.bf16.msra.mxu1 %v656_v14  ;;  %v57_v30 = vpack.c.bf16 %v56_v27, %v56_v27  ;;  %v665_v31 = vld [vmem:[#allocation5 + $0x48] sm:$0xff]   ;;  %v667_v33 = vld [vmem:[#allocation5 + $0x40] sm:$0xff]   ;;  %v669_v35 = vld [vmem:[%s847_s5 + $0x38] sm:$0xff]  }
  0x28   :  { %172 = vmatprep.subr.bf16.mxu0 %v638_v7  ;;  %572 = vmatprep.subr.bf16.mxu1 %v657_v15  ;;  %v666_v32 = vld [vmem:[#allocation5 + $0x8] sm:$0xff]   ;;  %v668_v34 = vld [vmem:[#allocation5] sm:$0xff]   ;;  %v670_v37 = vld [vmem:[%s847_s5 + $0x30] sm:$0xff]  }
  0x29   :  { %v671_v38 = vld [vmem:[%s847_s5 + $0x28] sm:$0xff]   ;;  %v672_v39 = vld [vmem:[%s847_s5 + $0x20] sm:$0xff]   ;;  %v673_v40 = vld [vmem:[%s847_s5 + $0x18] sm:$0xff]  }
  0x2a   :  { %v74_v44 = vld [vmem:[%s844_s2] sm:$0x3]  ;;  %v674_v58 = vld [vmem:[%s847_s5 + $0x10] sm:$0xff]   ;;  %v675_v59 = vld [vmem:[%s847_s5 + $0x8] sm:$0xff]  }
  0x2b   :  { %173 = vmatpush1.bf16.msra.mxu0 %v640_v8  ;;  %573 = vmatpush3.bf16.msra.mxu1 %v658_v18  ;;  %v79_v46 = vrot.slane %v74_v44, %v78_v43  ;;  %v83_v47 = vrot.slane %v74_v44, %v82_v45  ;;  %v676_v60 = vld [vmem:[%s847_s5] sm:$0xff]  }
  0x2c   :  { %174 = vmatprep.subr.bf16.mxu0 %v641_v9  ;;  %574 = vmatprep.subr.bf16.mxu1 %v659_v19  ;;  %v542_v62 = vld [vmem:[%s846_s4] ss:$0 sm:$0xff]  ;;  %s756_s4 = smov [#allocation7]  }
  0x2d   :  { %v559_v6 = vld [vmem:[%s848_s6] ss:$0 sm:$0xff]  ;;  %s516_s5 = sshll.u32 %s756_s4, 4  ;;  %s517_s5 = int_to_ptr.vmem [resolvable:$true] %s516_s5 }
  0x2e   :  { %s721_s6 = scalar_lea.vmem %s517_s5, 32  ;;  %p726_p11 = scmp.lt.s32.totalorder %s517_s5, %s517_s5 }
  0x2f   :  { %175 = vmatpush1.bf16.msra.mxu0 %v643_v12  ;;  %575 = vmatpush3.bf16.msra.mxu1 %v660_v23  ;;  %p722_p10 = scmp.ne.s32.totalorder %s517_s5, %s721_s6  ;;  %p727_p12 = scmp.lt.s32.totalorder %s721_s6, %s721_s6 }
  0x30   :  { %176 = vmatprep.subr.bf16.mxu0 %v644_v16  ;;  %576 = vmatprep.subr.bf16.mxu1 %v661_v24 }
  0x31   :  { %p728_p13 = por %p727_p12, %p726_p11 }
  0x33   :  { %177 = vmatpush1.bf16.msra.mxu0 %v646_v17  ;;  %577 = vmatpush3.bf16.msra.mxu1 %v662_v25  ;;  %p729_p0 = pnand %p728_p13, %p722_p10 }
  0x34   :  { %178 = vmatprep.subr.bf16.mxu0 %v647_v20  ;;  %578 = vmatprep.subr.bf16.mxu1 %v663_v28 }
  0x37   :  { %179 = vmatpush1.bf16.msra.mxu0 %v649_v21  ;;  %579 = vmatpush3.bf16.msra.mxu1 %v664_v29 }
  0x38   :  { %180 = vmatprep.subr.bf16.mxu0 %v650_v22  ;;  %580 = vmatprep.subr.bf16.mxu1 %v665_v31 }
  0x3b   :  { %181 = vmatpush1.bf16.msra.mxu0 %v652_v26  ;;  %581 = vmatpush3.bf16.msra.mxu1 %v666_v32 }
  0x3c   :  { %582 = vmatprep.subr.bf16.mxu1 %v667_v33  ;;  %599 = vmatprep.subr.bf16.mxu0 %v754_v36 }
  0x3e   :  { %199 = vmatmul.mubr.bf16.vlgmr.msra.gmra.mxu0 %v57_v30 }
  0x3f   :  { %583 = vmatpush3.bf16.msra.mxu1 %v668_v34  ;;  %600 = vmatpush3.bf16.msra.mxu0 %v669_v35 }
  0x40   :  { %601 = vmatprep.subr.bf16.mxu0 %v754_v36  ;;  %615 = vmatprep.mubr.msk.bf16.mxu0 %vm755_vm0, %v754_v36 }
  0x43   :  { %602 = vmatpush3.bf16.msra.mxu0 %v670_v37 }
  0x44   :  { %603 = vmatprep.subr.bf16.mxu0 %v754_v36 }
  0x47   :  { %604 = vmatpush3.bf16.msra.mxu0 %v671_v38 }
  0x48   :  { %605 = vmatprep.subr.bf16.mxu0 %v754_v36 }
  0x4b   :  { %606 = vmatpush3.bf16.msra.mxu0 %v672_v39 }
  0x4c   :  { %607 = vmatprep.subr.bf16.mxu0 %v754_v36 }
  0x4f   :  { %608 = vmatpush3.bf16.msra.mxu0 %v673_v40 }
  0x50   :  { %609 = vmatprep.subr.bf16.mxu0 %v754_v36 }
  0x53   :  { %610 = vmatpush3.bf16.msra.mxu0 %v674_v58 }
  0x54   :  { %611 = vmatprep.subr.bf16.mxu0 %v754_v36 }
  0x57   :  { %612 = vmatpush3.bf16.msra.mxu0 %v675_v59 }
  0x58   :  { %613 = vmatprep.subr.bf16.mxu0 %v754_v36 }
  0x5b   :  { %614 = vmatpush3.bf16.msra.mxu0 %v676_v60 }
  0xfe   :  { %v200_v48 = vpop.f32.mrf.mxu0 }
  0xff   :  { %v201_v49 = vadd.f32 %v200_v48, %v79_v46 }
 0x100   :  { %v202_v50 = vpop.f32.mrf.mxu0 }
 0x101   :  { %v203_v51 = vadd.f32 %v202_v50, %v83_v47  ;;  %v207_v52 = vmax.f32 %v201_v49, 0.0 }
 0x102   :  { %v204_v53 = vpop.f32.mrf.mxu0 }
 0x103   :  { %v208_v54 = vmax.f32 %v203_v51, 0.0  ;;  %v209_v57 = vpack.c.bf16 %v207_v52, %v207_v52 }
 0x104   :  { %v205_v55 = vpop.f32.mrf.mxu0 }
 0x105   :  { %v210_v56 = vpack.c.bf16 %v208_v54, %v208_v54 }
 0x107   :  { %378 = vmatprep.mubr.bf16.mxu1 %v210_v56 }
 0x108   :  { %379 = vmatmul.mubr.bf16.vlgmr.msra.gmra.mxu1 %v209_v57 }
 0x1c8   :  { %v584_v61 = vpop.f32.mrf.mxu1 }
 0x1ca   :  { %v585_v63 = vpop.f32.mrf.mxu1 }
 0x1cb   :  { %v586_v0 = vadd.f32 %v585_v63, %v584_v61 }
 0x1cc   :  { %v587_v1 = vpop.f32.mrf.mxu1 }
 0x1cd   :  { %v381_v2 = vadd.f32 %v586_v0, %v542_v62 }
 0x1ce   :  { %v588_v3 = vpop.f32.mrf.mxu1 }
 0x1cf   :  { %v386_v4 = vmax.f32 %v381_v2, 0.0 }
 0x1d1   :  { %v387_v5 = vpack.c.bf16 %v386_v4, %v386_v4 }
 0x1d3   :  { %616 = vmatmul.mubr.bf16.vlgmr.msra.gmra.mxu0 %v387_v5 }
 0x293   :  { %v493_v7 = vpop.f32.mrf.mxu0 }
 0x294   :  { %v494_v8 = vadd.f32 %v559_v6, %v493_v7 }
 0x295   :  { %v617_v9 = vpop.f32.mrf.mxu0 }
 0x296   :  { %v500_v10 = vand.u32 2147483647, %v494_v8  ;;  %v499_v18 = vmax.f32 %v494_v8, 0.0 }
 0x297   :  { %v496_v11 = vpop.f32.mrf.mxu0 }
 0x298   :  { %v501_v12 = vsub.f32 0.0, %v500_v10 }
 0x299   :  { %v618_v13 = vpop.f32.mrf.mxu0 }
 0x29a   :  { %v502_v14 = vmul.f32 1.442695, %v501_v12 }
 0x29c   :  { %677 = vpow2.f32 %v502_v14 }
 0x2a9   :  { %v678_v15 = vpop.eup %677 }
 0x2aa   :  { %v504_v16 = vadd.f32 1.0, %v678_v15 }
 0x2ac   :  { %679 = vlog2.f32 %v504_v16 }
 0x2b9   :  { %v680_v17 = vpop.eup %679 }
 0x2ba   :  { %v506_v19 = vmul.f32 0.6931472, %v680_v17 }
 0x2bc   :  { %v507_v20 = vadd.f32 %v506_v19, %v499_v18 }
 0x2be   :  { %509 = vst.msk [vmem:[#allocation7] sm:$0x3] %vm508_vm1, %v507_v20 }
 0x2bf   :  { %732 = shalt.err (!%p729_p0)
}
 0x2c0   :  { %519 = dma.vmem_to_hbm [thread:$0]  %s517_s5, 32, %s849_s7, [#allocation4]  }
 0x2c1   :  { %745 = dma.done.wait [#allocation4], 32  }
 0x2c2   :  { %746 = vsyncadd [#allocation4], 4294967264 }
 0x2c3   :  { %523 = vsyncpa [#allocation3], 1 }
 0x2c4   :  { %524 = vsyncpa [#allocation6], 1 }
 0x2c5   :  { %525 = vsyncpa [#allocation4], 1 }

</bundles_post_ra>
